<compile_context>
chip_gen: v6e
topology: v6e:2x2x1
jax: 0.10.0
libtpu: 0.0.40
codegen_flags: <defaults>
</compile_context>

<pallas_src>
import math

import jax
import jax.numpy as jnp
from jax.experimental import pallas as pl
from jax.experimental.pallas import tpu as pltpu


# ----------------------------------------------------------------------------
# Tile selection
# ----------------------------------------------------------------------------
def _round_up(x, m):
    return (x + m - 1) // m * m


def _pick_tile_m(n_pad):
    # Output node-block tile: as large as possible while keeping >= 2 blocks
    # so the "parallel" grid axis can shard across v7x's 2 TensorCores.
    for t in (512, 256, 128):
        if n_pad % t == 0 and n_pad // t >= 2:
            return t
    return 128


def _pick_tile_k(n_pad):
    # Contraction tile (A lane dim / XW sublane dim): fill the 256-wide MXU.
    for t in (512, 256, 128):
        if n_pad % t == 0:
            return t
    return 128


# ----------------------------------------------------------------------------
# Kernel 1: dense feature transform   XW = X @ W   (per node block), bf16 out.
# ----------------------------------------------------------------------------
def _xw_kernel(x_ref, w_ref, o_ref):
    o_ref[...] = jnp.dot(
        x_ref[...], w_ref[...], preferred_element_type=jnp.float32
    ).astype(o_ref.dtype)


def gcn_feature_transform(x, w, tm):
    """XW = X @ W, tiled over node blocks.  Output in bf16 for the SpMM."""
    n_pad, f_pad = x.shape
    h_pad = w.shape[1]
    return pl.pallas_call(
        _xw_kernel,
        out_shape=jax.ShapeDtypeStruct((n_pad, h_pad), jnp.bfloat16),
        grid_spec=pltpu.PrefetchScalarGridSpec(
            num_scalar_prefetch=0,
            grid=(n_pad // tm,),
            in_specs=[
                pl.BlockSpec((tm, f_pad), lambda i: (i, 0)),     # X node block
                pl.BlockSpec((f_pad, h_pad), lambda i: (0, 0)),  # W resident
            ],
            out_specs=pl.BlockSpec((tm, h_pad), lambda i: (i, 0)),
        ),
        compiler_params=pltpu.CompilerParams(
            dimension_semantics=("parallel",),
            vmem_limit_bytes=32 * 1024 * 1024,
        ),
    )(x, w)


# ----------------------------------------------------------------------------
# Kernel 2: block-sparse aggregation   out[i] = sum_k A[i, blk(i,k)] @ XW[blk]
# ----------------------------------------------------------------------------
def _spmm_kernel(counts_ref, blk_ids_ref, a_ref, xw_ref, o_ref):
    # counts_ref:  (ni,)              SMEM  #nonzero blocks per block-row
    # blk_ids_ref: (ni, max_blocks)   SMEM  nonzero block-column ids (padded)
    # a_ref:       (TM, TK)  bf16     dense A_hat block at (i, blk_ids[i,kk])
    # xw_ref:      (TK, H)   bf16     XW block at block-row blk_ids[i,kk]
    # o_ref:       (TM, H)   f32      output block, resident across kk
    del blk_ids_ref  # consumed by the index_maps only
    i = pl.program_id(0)
    kk = pl.program_id(1)

    @pl.when(kk == 0)
    def _():
        o_ref[...] = jnp.zeros_like(o_ref)

    @pl.when(kk < counts_ref[i])
    def _():
        o_ref[...] += jnp.dot(
            a_ref[...], xw_ref[...], preferred_element_type=jnp.float32
        )


def gcn_aggregate(a_bf16, xw_bf16, counts, blk_ids, tm, tk):
    """out = A_hat @ XW using the block-sparsity pattern in (counts, blk_ids)."""
    n_pad = a_bf16.shape[0]
    h_pad = xw_bf16.shape[1]
    ni = n_pad // tm
    max_blocks = blk_ids.shape[1]
    return pl.pallas_call(
        _spmm_kernel,
        out_shape=jax.ShapeDtypeStruct((n_pad, h_pad), jnp.float32),
        grid_spec=pltpu.PrefetchScalarGridSpec(
            num_scalar_prefetch=2,                       # counts, blk_ids -> SMEM
            grid=(ni, max_blocks),                       # reduction axis last
            in_specs=[
                # A block follows the prefetched nonzero-block schedule; padded
                # entries repeat the previous index so Pallas skips the DMA.
                pl.BlockSpec((tm, tk), lambda i, kk, cnt, blk: (i, blk[i, kk])),
                pl.BlockSpec((tk, h_pad), lambda i, kk, cnt, blk: (blk[i, kk], 0)),
            ],
            out_specs=pl.BlockSpec((tm, h_pad), lambda i, kk, cnt, blk: (i, 0)),
        ),
        compiler_params=pltpu.CompilerParams(
            dimension_semantics=("parallel", "arbitrary"),
            vmem_limit_bytes=32 * 1024 * 1024,
        ),
    )(counts, blk_ids, a_bf16, xw_bf16)


# ----------------------------------------------------------------------------
# Preprocessing: padding, CSR -> dense A_hat, block-sparsity metadata.
# ----------------------------------------------------------------------------
def _pad_2d(x, rows, cols):
    out = jnp.zeros((rows, cols), x.dtype)
    return out.at[: x.shape[0], : x.shape[1]].set(x)


def _csr_to_dense_padded(col_idx, values, num_neighbors, n, n_pad):
    e = col_idx.shape[0]
    row_of_edge = jnp.repeat(
        jnp.arange(n, dtype=jnp.int32), num_neighbors, total_repeat_length=e
    )
    a = jnp.zeros((n_pad, n_pad), jnp.float32)
    # .add (not .set) so duplicate CSR entries, if any, are summed.
    return a.at[row_of_edge, col_idx].add(values)


def _block_sparsity(a_dense, tm, tk):
    """Per block-row: (#nonzero blocks, nonzero block-column ids padded by
    repeating the last valid id)."""
    n_pad = a_dense.shape[0]
    ni, nk = n_pad // tm, n_pad // tk
    nz = jnp.any(a_dense.reshape(ni, tm, nk, tk) != 0.0, axis=(1, 3))  # (ni, nk)
    counts = nz.sum(axis=1).astype(jnp.int32)
    # Nonzero block-columns first (argsort of 0/1 keys, stable -> ascending).
    order = jnp.argsort(jnp.logical_not(nz).astype(jnp.int32), axis=1)
    order = order.astype(jnp.int32)
    # Graph structure is static -> metadata built eagerly (needs concrete A).
    max_blocks = max(int(counts.max()), 1)
    kk = jnp.arange(max_blocks, dtype=jnp.int32)[None, :]
    clamped = jnp.minimum(kk, jnp.maximum(counts[:, None] - 1, 0))
    blk_ids = jnp.take_along_axis(order, clamped, axis=1).astype(jnp.int32)
    return counts, blk_ids


def init_gcn_params(key, input_dim, hidden_dim, output_dim):
    # Matches GCN.__init__ / GCNLayer.__init__: pad input_dim to multiple of 4,
    # scale = 1/sqrt(actual_in_features).
    input_dim_padded = (input_dim + 3) // 4 * 4
    k1, k2 = jax.random.split(key)
    w1 = jax.random.normal(k1, (input_dim_padded, hidden_dim), jnp.float32) * (
        1.0 / math.sqrt(input_dim)
    )
    w2 = jax.random.normal(k2, (hidden_dim, output_dim), jnp.float32) * (
        1.0 / math.sqrt(hidden_dim)
    )
    return input_dim_padded, w1, w2


def gcn_forward(row_ptr, col_idx, values, X, num_neighbors, w1, w2):
    """2-layer GCN forward: A_hat @ ((A_hat @ (X_pad @ W1)) @ W2)."""
    del row_ptr  # row structure is carried by num_neighbors for densification
    n, _ = X.shape
    in_dim_padded, hidden = w1.shape
    _, out_dim = w2.shape

    # TPU lane-dense padding: last dims to multiples of 128.
    n_pad = _round_up(max(n, 128), 128)
    f_pad = _round_up(max(in_dim_padded, 128), 128)
    h_pad = _round_up(max(hidden, 128), 128)
    o_pad = _round_up(max(out_dim, 128), 128)

    tm = _pick_tile_m(n_pad)
    tk = _pick_tile_k(n_pad)

    a_dense = _csr_to_dense_padded(col_idx, values, num_neighbors, n, n_pad)
    counts, blk_ids = _block_sparsity(a_dense, tm, tk)
    a_bf16 = a_dense.astype(jnp.bfloat16)

    # Zero padding keeps results identical to restricting to the true widths.
    x_p = _pad_2d(X, n_pad, f_pad)
    w1_p = _pad_2d(w1, f_pad, h_pad)
    w2_p = _pad_2d(w2, h_pad, o_pad)

    # Layer 1
    xw1 = gcn_feature_transform(x_p, w1_p, tm)            # (n_pad, h_pad) bf16
    h1 = gcn_aggregate(a_bf16, xw1, counts, blk_ids, tm, tk)  # f32
    # Layer 2
    xw2 = gcn_feature_transform(h1, w2_p, tm)              # (n_pad, o_pad) bf16
    h2 = gcn_aggregate(a_bf16, xw2, counts, blk_ids, tm, tk)  # f32

    return h2[:n, :out_dim]


# ----------------------------------------------------------------------------
# Deterministic graph construction (ring graph) + CSR of A_hat = D^-1/2 A D^-1/2,
# mirroring the preprocessing in train_gcn.py.
# ----------------------------------------------------------------------------
def build_ring_graph_csr(n):
    nbrs = [sorted({(i - 1) % n, (i + 1) % n}) for i in range(n)]
    deg = [len(nb) for nb in nbrs]
    d_inv_sqrt = [1.0 / math.sqrt(d) for d in deg]
    row_ptr, col_idx, values = [0], [], []
    for i in range(n):
        for j in nbrs[i]:
            col_idx.append(j)
            values.append(d_inv_sqrt[i] * d_inv_sqrt[j])
        row_ptr.append(len(col_idx))
    num_neighbors = [row_ptr[i + 1] - row_ptr[i] for i in range(n)]
    return (jnp.asarray(row_ptr, jnp.int32),
            jnp.asarray(col_idx, jnp.int32),
            jnp.asarray(values, jnp.float32),
            jnp.asarray(num_neighbors, jnp.int32))


if __name__ == "__main__":
    # Small shapes consistent with the module (PPI-like feature width).
    N = 256           # nodes  (-> 2 node blocks of 128 for megacore sharding)
    INPUT_DIM = 50    # actual feature dim (module pads to 52; kernel pads to 128)
    HIDDEN_DIM = 64
    OUTPUT_DIM = 32

    key = jax.random.PRNGKey(0)
    kx, kp = jax.random.split(key)

    row_ptr, col_idx, values, num_neighbors = build_ring_graph_csr(N)
    assert int(num_neighbors.sum()) == col_idx.shape[0], "CSR nnz mismatch"

    X = jax.random.normal(kx, (N, INPUT_DIM), jnp.float32)
    input_dim_padded, W1, W2 = init_gcn_params(kp, INPUT_DIM, HIDDEN_DIM,
                                               OUTPUT_DIM)

    out = gcn_forward(row_ptr, col_idx, values, X, num_neighbors, W1, W2)
    out = jax.block_until_ready(out)

    # Pure-JAX dense f32 reference for correctness.
    row_of_edge = jnp.repeat(jnp.arange(N, dtype=jnp.int32), num_neighbors)
    A_dense = jnp.zeros((N, N), jnp.float32).at[row_of_edge, col_idx].add(values)
    Xp = jnp.zeros((N, input_dim_padded), jnp.float32).at[:, :INPUT_DIM].set(X)
    h1_ref = A_dense @ (Xp @ W1)
    h2_ref = A_dense @ (h1_ref @ W2)

    assert out.shape == (N, OUTPUT_DIM)
    max_err = float(jnp.max(jnp.abs(out - h2_ref)))
    # Tolerance loosened slightly for the bf16 A / XW streams (f32 accumulation).
    assert jnp.allclose(out, h2_ref, atol=3e-2, rtol=3e-2), f"max err {max_err}"
    print("KERNEL_OK")
</pallas_src>

<mosaic_0001>
module attributes {stable_mosaic.version = 11 : i64} {
  func.func @_xw_kernel(%arg0: i32, %arg1: memref<128x128xf32, #tpu.memory_space<vmem>>, %arg2: memref<128x128xf32, #tpu.memory_space<vmem>>, %arg3: memref<128x128xbf16, #tpu.memory_space<vmem>>) attributes {dimension_semantics = [#tpu.dimension_semantics<parallel>], iteration_bounds = array<i64: 2>, scalar_prefetch = 0 : i64, scratch_operands = 0 : i64, tpu.core_type = #tpu.core_type<tc>, window_params = [{transform_indices = @transform_0, window_bounds = array<i64: 128, 128>}, {pipeline_mode = #tpu.pipeline_mode<synchronous>, transform_indices = @transform_1, window_bounds = array<i64: 128, 128>}, {transform_indices = @transform_2, window_bounds = array<i64: 128, 128>}]} {
    %c0 = arith.constant 0 : index
    %c0_0 = arith.constant 0 : index
    %0 = vector.load %arg1[%c0, %c0_0] : memref<128x128xf32, #tpu.memory_space<vmem>>, vector<128x128xf32>
    %c0_1 = arith.constant 0 : index
    %c0_2 = arith.constant 0 : index
    %1 = vector.load %arg2[%c0_1, %c0_2] : memref<128x128xf32, #tpu.memory_space<vmem>>, vector<128x128xf32>
    %cst = arith.constant dense<0.000000e+00> : vector<128x128xf32>
    %2 = tpu.matmul %0, %1, %cst {dimension_numbers = #tpu.dot_dimension_numbers<[1], [0], [0], [1], [0, 0, 1, 1], [], []>} : vector<128x128xf32>, vector<128x128xf32>, vector<128x128xf32> -> vector<128x128xf32>
    %3 = arith.truncf %2 : vector<128x128xf32> to vector<128x128xbf16>
    %c0_3 = arith.constant 0 : index
    %c0_4 = arith.constant 0 : index
    %4 = vector.load %arg3[%c0_3, %c0_4] : memref<128x128xbf16, #tpu.memory_space<vmem>>, vector<128x128xbf16>
    tpu.vector_store %arg3[%c0_3, %c0_4], %3 {strides = array<i32>} : memref<128x128xbf16, #tpu.memory_space<vmem>>, vector<128x128xbf16>,
    return
  }
  func.func @transform_0(%arg0: i32) -> (i32, i32) {
    %c0_i32 = arith.constant 0 : i32
    %c0_i32_0 = arith.constant 0 : i32
    return %arg0, %c0_i32 : i32, i32
  }
  func.func @transform_1(%arg0: i32) -> (i32, i32) {
    %c0_i32 = arith.constant 0 : i32
    %c0_i32_0 = arith.constant 0 : i32
    %c0_i32_1 = arith.constant 0 : i32
    return %c0_i32, %c0_i32_0 : i32, i32
  }
  func.func @transform_2(%arg0: i32) -> (i32, i32) {
    %c0_i32 = arith.constant 0 : i32
    %c0_i32_0 = arith.constant 0 : i32
    return %arg0, %c0_i32 : i32, i32
  }
}

</mosaic_0001>

<bundles_post_ra>
// kernel: tpu_custom_call.1
= control target key start
LH: loop header
LB: loop body
LE: loop exit
PB: predicated region body
PF: predicated region fallthrough
CT: control target
= control target key end

     0   :  { %7 = vsyncpa [#allocation3], 0  ;;  %s1159_s0 = inlined_call_operand.hbm [shape: f32[256,128], index: 0, kind: input, shape index: {}]   ;;  %s1160_s1 = inlined_call_operand.hbm [shape: f32[128,128], index: 1, kind: input, shape index: {}]   ;;  %s1161_s2 = inlined_call_operand.hbm [shape: bf16[256,128], index: 2, kind: output, shape index: {}]  }
   0x1   :  { %9 = vsyncpa [#allocation3 + $0x1], 0 }
   0x2   :  { %10 = vsyncpa [#allocation6], 0 }
   0x3   :  { %11 = vsyncpa [#allocation4], 0 }
   0x4   :  { %13 = vsyncpa [#allocation4 + $0x1], 0  ;;  %s957_s9 = smov 0   ;;  %s959_s10 = smov 0  }
   0x5   :  { %s961_s11 = smov 0   ;;  %s963_s12 = smov 0  }
   0x6 LB: > { %s978_s13 = sadd.s32 4294967295, %s933_s12   ;;  %s533_s14 = sadd.s32 4294967294, %s933_s12   ;;  %s933_s12 = sphi %s963_s12, %s1183_s12   ;;  %s929_s11 = sphi %s961_s11, %s1182_s11   ;;  %s925_s10 = sphi %s959_s10, %s1181_s10   ;;  %s921_s9 = sphi %s957_s9, %s1180_s9  }
   0x7   : > { %p39_p0 = scmp.ne.s32.totalorder %s925_s10, %s921_s9  ;;  %p1162_p1 = scmp.eq.s32.totalorder %s978_s13, 0 }
   0x8   : > { %p90_p3 = scmp.eq.s32.totalorder %s533_s14, 1  ;;  %p534_p5 = scmp.ge.s32.totalorder %s933_s12, 1 }
   0x9   : > { %p987_p4 = por %p1162_p1, %p39_p0  ;;  %p97_p7 = scmp.lt.s32.totalorder %s933_s12, 3 }
   0xa   : > { %p992_p6 = por %p90_p3, %p39_p0  ;;  %s935_s18 = smov [#allocation5]  }
   0xb   : > { %s1166_s15 = scalar_select %p987_p4, 1, 0 }
   0xc   : > { %s1167_s16 = scalar_select %p992_p6, 1, 0 }
   0xd   : > { %p997_p8 = pnand %p534_p5, %p97_p7  ;;  %s109_s19 = sshll.u32 %s935_s18, 4  ;;  %s110_s19 = int_to_ptr.vmem [resolvable:$true] %s109_s19 }
   0xe   : > { %s1011_s21 = sadd.s32 1, %s933_s12   ;;  %s26_s22 = sadd.s32 1, %s929_s11 }
   0xf   : > { %s1168_s17 = scalar_select %p997_p8, 1, 0 }
  0x10   : > { %p758_p9 = pneg %p997_p8  ;;  %s23_s23 = ssub.s32 %s933_s12, %s1011_s21 }
  0x11   : > { %s822_s24 = scalar_lea.vmem %s110_s19, 2048  ;;  %p830_p5 = scmp.lt.s32.totalorder %s110_s19, %s110_s19 }
  0x12   : > { %p1006_p11 = pnand %p758_p9, %p1162_p1  ;;  %p823_p13 = scmp.ne.s32.totalorder %s110_s19, %s822_s24 }
  0x13   : > { %p831_p7 = scmp.lt.s32.totalorder %s822_s24, %s822_s24 }
  0x14   : > { %p813_p12 = pneg %p1006_p11 }
  0x15   : > { %p832_p10 = por %p831_p7, %p830_p5 }
  0x16   : > { %p825_p0 = pnand %p823_p13, %p813_p12 }
  0x18   : > { %p826_p3 = pneg %p825_p0 }
  0x1a   : > { %p833_p2 = pnand %p832_p10, %p826_p3 }
  0x1c   : > { %836 = shalt.err (!%p833_p2)
}
  0x1d   : > { %s936_s25 = smov 128   ;;  %s937_s26 = smov 8  }
  0x1e   : > { %761 = dma.hbm_to_vmem [thread:$0]  (!%p1006_p11), %s1160_s1, 2048, %s110_s19, [#allocation6], %s936_s25, %s936_s25, %s937_s26  }
  0x1f   : > { %p24_p2 = scmp.eq.s32.totalorder %s23_s23, 0  ;;  %p33_p9 = scmp.ne.s32.totalorder %s929_s11, %s925_s10 }
  0x20   : > { %p34_p10 = scmp.eq.s32.totalorder %s933_s12, 0  ;;  %p771_p12 = scmp.lt.s32.totalorder %s933_s12, 2 }
  0x21   : > { %s1031_s29 = scalar_select %p24_p2, %s929_s11, %s26_s22  }
  0x22   : > { %p35_p13 = por %p34_p10, %p33_p9  ;;  %p1170_p0 = scmp.eq.s32.totalorder %s978_s13, 1 }
  0x23   : > { %s123_s3 = sand.u32 1, %s929_s11   ;;  %s565_s4 = sshll.u32 %s933_s12, 11 }
  0x24   : > { %p1035_p3 = por %p1170_p0, %p33_p9  ;;  %s537_s5 = sshll.u32 %s123_s3, 7 }
  0x25   : > { %s1044_s8 = scalar_lea.hbm %s1159_s0, %s565_s4  ;;  %s127_s14 = scalar_lea.vmem [#allocation2], %s537_s5 }
  0x26   : > { %s1171_s30 = scalar_select %p1035_p3, 1, 0 }
  0x27   : > { %s134_s18 = sshll.u32 %s127_s14, 4  ;;  %p1046_p11 = pnand %p771_p12, %p35_p13  ;;  %s1050_s18 = int_to_ptr.vmem [resolvable:$true] %s134_s18 }
  0x28   : > { %s1052_s20 = scalar_lea.sflag [#allocation3], %s123_s3  ;;  %s837_s22 = scalar_lea.hbm %s1044_s8, 2048 }
  0x29   : > { %p838_p5 = scmp.ne.s32.totalorder %s1044_s8, %s837_s22  ;;  %p839_p7 = pneg %p1046_p11 }
  0x2a   : > { %s842_s27 = scalar_lea.hbm %s1159_s0, 4096  ;;  %p843_p10 = scmp.lt.s32.totalorder %s1044_s8, %s1159_s0 }
  0x2b   : > { %p840_p2 = pnand %p839_p7, %p838_p5  ;;  %p844_p12 = scmp.lt.s32.totalorder %s842_s27, %s837_s22 }
  0x2d   : > { %p841_p9 = pneg %p840_p2  ;;  %p845_p13 = por %p844_p12, %p843_p10 }
  0x2f   : > { %p846_p0 = pnand %p845_p13, %p841_p9 }
  0x31   : > { %849 = shalt.err (!%p846_p0)
}
  0x32   : > { %s850_s3 = scalar_lea.vmem %s1050_s18, 2048  ;;  %s938_s5 = smov [#allocation2]  }
  0x33   : > { %p851_p1 = scmp.ne.s32.totalorder %s1050_s18, %s850_s3  ;;  %s855_s6 = sshll.u32 %s938_s5, 4  ;;  %s856_s6 = int_to_ptr.vmem [resolvable:$false] %s855_s6 }
  0x34   : > { %s857_s7 = scalar_lea.vmem %s856_s6, 4096  ;;  %p858_p2 = scmp.lt.s32.totalorder %s1050_s18, %s856_s6 }
  0x35   : > { %p853_p6 = pnand %p851_p1, %p839_p7  ;;  %p859_p3 = scmp.lt.s32.totalorder %s857_s7, %s850_s3 }
  0x37   : > { %p854_p5 = pneg %p853_p6  ;;  %p860_p4 = por %p859_p3, %p858_p2 }
  0x39   : > { %p861_p8 = pnand %p860_p4, %p854_p5 }
  0x3b   : > { %864 = shalt.err (!%p861_p8)
}
  0x3c   : > { %765 = dma.hbm_to_vmem [thread:$0]  (!%p1046_p11), %s1044_s8, 2048, %s1050_s18, %s1052_s20, %s936_s25, %s936_s25, %s937_s26  }
  0x3d   : > { %p1173_p1 = scmp.ne.s32.totalorder %s1168_s17, 0 }
  0x3e   : > { %s1079_s14 = sand.u32 (!%p1173_p1), 1, %s925_s10   ;;  %p1174_p4 = scmp.ne.s32.totalorder (!%p1173_p1), %s1166_s15, 0 }
  0x3f   : > { %146 = sbr.rel (%p1173_p1) target bundleno = 329 (0x149), region = 28  ;;  %s541_s22 = sshll.u32 (!%p1173_p1), %s1079_s14, 7 }
  0x40   : > { %s149_s23 = scalar_lea.sflag (!%p1173_p1), [#allocation3], %s1079_s14  ;;  %s1083_s24 = scalar_lea.vmem (!%p1173_p1), [#allocation2], %s541_s22 }
  0x44   : > { %908 = dma.done.wait (%p1174_p4), %s149_s23, 2048  }
  0x45   : > { %910 = vsyncadd (%p1174_p4), %s149_s23, 4294965248  ;;  %p1175_p6 = scmp.eq.s32.totalorder %s978_s13, 0 }
  0x47   : > { %912 = dma.done.wait (%p1175_p6), [#allocation6], 2048   ;;  %p1176_p8 = pmov %p1175_p6 }
  0x48   : > { %v210_v0 = vld [vmem:[#allocation5 + $0x78] sm:$0xff]  ;;  %v209_v1 = vld [vmem:[#allocation5 + $0x70] sm:$0xff]  ;;  %v208_v2 = vld [vmem:[#allocation5 + $0x68] sm:$0xff]  ;;  %s543_s15 = sshll.u32 %s1079_s14, 6  ;;  %s582_s26 = sshll.u32 %s978_s13, 10 }
  0x49   : > { %914 = vsyncadd (%p1176_p8), [#allocation6], 4294965248  ;;  %662 = vmatprep.subr.mxu0 %v210_v0  ;;  %718 = vmatprep.subr.mxu1 %v210_v0  ;;  %v207_v3 = vld [vmem:[#allocation5 + $0x60] sm:$0xff]  ;;  %v206_v4 = vld [vmem:[#allocation5 + $0x58] sm:$0xff]  ;;  %s176_s17 = scalar_lea.vmem [#allocation7], %s543_s15  ;;  %s1116_s19 = scalar_lea.hbm %s1161_s2, %s582_s26 }
  0x4a   : > { %663 = vmatpush3.msra.mxu0 %v210_v0  ;;  %734 = vmatpush3.msra.mxu1 %v210_v0  ;;  %v205_v5 = vld [vmem:[#allocation5 + $0x50] sm:$0xff]  ;;  %v204_v6 = vld [vmem:[#allocation5 + $0x48] sm:$0xff]  ;;  %v203_v7 = vld [vmem:[#allocation5 + $0x40] sm:$0xff]  ;;  %s450_s25 = sshll.u32 %s176_s17, 4  ;;  %s437_s13 = scalar_lea.sflag [#allocation4], %s1079_s14  ;;  %s1111_s25 = int_to_ptr.vmem [resolvable:$true] %s450_s25 }
  0x4b   : > { %664 = vmatprep.subr.mxu0 %v209_v1  ;;  %719 = vmatprep.subr.mxu1 %v209_v1  ;;  %v202_v8 = vld [vmem:[#allocation5 + $0x38] sm:$0xff]  ;;  %v201_v9 = vld [vmem:[#allocation5 + $0x30] sm:$0xff]  ;;  %v200_v10 = vld [vmem:[#allocation5 + $0x28] sm:$0xff]  ;;  %s865_s20 = scalar_lea.vmem %s1111_s25, 1024  ;;  %p1177_p11 = scmp.ne.s32.totalorder %s1171_s30, 0 }
  0x4c   : > { %665 = vmatpush3.msra.mxu0 %v209_v1  ;;  %735 = vmatpush3.msra.mxu1 %v209_v1  ;;  %v199_v11 = vld [vmem:[#allocation5 + $0x20] sm:$0xff]  ;;  %v198_v12 = vld [vmem:[#allocation5 + $0x18] sm:$0xff]  ;;  %v197_v13 = vld [vmem:[#allocation5 + $0x10] sm:$0xff]  ;;  %p866_p3 = scmp.ne.s32.totalorder %s1111_s25, %s865_s20  ;;  %s939_s27 = smov [#allocation7]  }
  0x4d   : > { %666 = vmatprep.subr.mxu0 %v208_v2  ;;  %720 = vmatprep.subr.mxu1 %v208_v2  ;;  %v196_v14 = vld [vmem:[#allocation5 + $0x8] sm:$0xff]  ;;  %v195_v15 = vld [vmem:[#allocation5] sm:$0xff]  ;;  %v181_v20 = vld [vmem:[%s1083_s24 + $0x10] sm:$0xff]  ;;  %s869_s28 = sshll.u32 %s939_s27, 4  ;;  %s870_s28 = int_to_ptr.vmem [resolvable:$false] %s869_s28 }
  0x4e   : > { %667 = vmatpush3.msra.mxu0 %v208_v2  ;;  %736 = vmatpush3.msra.mxu1 %v208_v2  ;;  %v179_v16 = vld [vmem:[%s1083_s24] sm:$0xff]  ;;  %v180_v18 = vld [vmem:[%s1083_s24 + $0x8] sm:$0xff]  ;;  %v189_v21 = vld [vmem:[%s1083_s24 + $0x50] sm:$0xff]  ;;  %p867_p7 = pnand %p866_p3, %p1177_p11  ;;  %s871_s4 = scalar_lea.vmem %s870_s28, 2048 }
  0x4f   : > { %668 = vmatprep.subr.mxu0 %v207_v3  ;;  %721 = vmatprep.subr.mxu1 %v207_v3  ;;  %v187_v17 = vld [vmem:[%s1083_s24 + $0x40] sm:$0xff]  ;;  %v188_v19 = vld [vmem:[%s1083_s24 + $0x48] sm:$0xff]  ;;  %v182_v22 = vld [vmem:[%s1083_s24 + $0x18] sm:$0xff]  ;;  %p872_p10 = scmp.lt.s32.totalorder %s1111_s25, %s870_s28  ;;  %p873_p12 = scmp.lt.s32.totalorder %s871_s4, %s865_s20 }
  0x50   : > { %669 = vmatpush3.msra.mxu0 %v207_v3  ;;  %737 = vmatpush3.msra.mxu1 %v207_v3  ;;  %v190_v23 = vld [vmem:[%s1083_s24 + $0x58] sm:$0xff]  ;;  %v183_v24 = vld [vmem:[%s1083_s24 + $0x20] sm:$0xff]  ;;  %v184_v26 = vld [vmem:[%s1083_s24 + $0x28] sm:$0xff]  ;;  %p868_p9 = pneg %p867_p7 }
  0x51   : > { %670 = vmatprep.subr.mxu0 %v206_v4  ;;  %722 = vmatprep.subr.mxu1 %v206_v4  ;;  %v191_v25 = vld [vmem:[%s1083_s24 + $0x60] sm:$0xff]  ;;  %v192_v27 = vld [vmem:[%s1083_s24 + $0x68] sm:$0xff]  ;;  %v185_v28 = vld [vmem:[%s1083_s24 + $0x30] sm:$0xff]  ;;  %p874_p13 = por %p873_p12, %p872_p10 }
  0x52   : > { %671 = vmatpush3.msra.mxu0 %v206_v4  ;;  %738 = vmatpush3.msra.mxu1 %v206_v4  ;;  %v193_v29 = vld [vmem:[%s1083_s24 + $0x70] sm:$0xff]  ;;  %v186_v30 = vld [vmem:[%s1083_s24 + $0x38] sm:$0xff] }
  0x53   : > { %672 = vmatprep.subr.mxu0 %v205_v5  ;;  %723 = vmatprep.subr.mxu1 %v205_v5  ;;  %v194_v31 = vld [vmem:[%s1083_s24 + $0x78] sm:$0xff]  ;;  %p875_p0 = pnand %p874_p13, %p868_p9 }
  0x54   : > { %673 = vmatpush3.msra.mxu0 %v205_v5  ;;  %739 = vmatpush3.msra.mxu1 %v205_v5 }
  0x55   : > { %674 = vmatprep.subr.mxu0 %v204_v6  ;;  %724 = vmatprep.subr.mxu1 %v204_v6 }
  0x56   : > { %675 = vmatpush3.msra.mxu0 %v204_v6  ;;  %740 = vmatpush3.msra.mxu1 %v204_v6 }
  0x57   : > { %676 = vmatprep.subr.mxu0 %v203_v7  ;;  %725 = vmatprep.subr.mxu1 %v203_v7 }
  0x58   : > { %677 = vmatpush3.msra.mxu0 %v203_v7  ;;  %741 = vmatpush3.msra.mxu1 %v203_v7 }
  0x59   : > { %678 = vmatprep.subr.mxu0 %v202_v8  ;;  %726 = vmatprep.subr.mxu1 %v202_v8 }
  0x5a   : > { %679 = vmatpush3.msra.mxu0 %v202_v8  ;;  %742 = vmatpush3.msra.mxu1 %v202_v8 }
  0x5b   : > { %680 = vmatprep.subr.mxu0 %v201_v9  ;;  %727 = vmatprep.subr.mxu1 %v201_v9 }
  0x5c   : > { %681 = vmatpush3.msra.mxu0 %v201_v9  ;;  %743 = vmatpush3.msra.mxu1 %v201_v9 }
  0x5d   : > { %682 = vmatprep.subr.mxu0 %v200_v10  ;;  %728 = vmatprep.subr.mxu1 %v200_v10 }
  0x5e   : > { %683 = vmatpush3.msra.mxu0 %v200_v10  ;;  %744 = vmatpush3.msra.mxu1 %v200_v10 }
  0x5f   : > { %684 = vmatprep.subr.mxu0 %v199_v11  ;;  %729 = vmatprep.subr.mxu1 %v199_v11 }
  0x60   : > { %685 = vmatpush3.msra.mxu0 %v199_v11  ;;  %745 = vmatpush3.msra.mxu1 %v199_v11 }
  0x61   : > { %686 = vmatprep.subr.mxu0 %v198_v12  ;;  %730 = vmatprep.subr.mxu1 %v198_v12 }
  0x62   : > { %687 = vmatpush3.msra.mxu0 %v198_v12  ;;  %746 = vmatpush3.msra.mxu1 %v198_v12 }
  0x63   : > { %688 = vmatprep.subr.mxu0 %v197_v13  ;;  %731 = vmatprep.subr.mxu1 %v197_v13 }
  0x64   : > { %689 = vmatpush3.msra.mxu0 %v197_v13  ;;  %747 = vmatpush3.msra.mxu1 %v197_v13 }
  0x65   : > { %690 = vmatprep.subr.mxu0 %v196_v14  ;;  %732 = vmatprep.subr.mxu1 %v196_v14 }
  0x66   : > { %691 = vmatpush3.msra.mxu0 %v196_v14  ;;  %748 = vmatpush3.msra.mxu1 %v196_v14 }
  0x67   : > { %692 = vmatprep.subr.mxu0 %v195_v15  ;;  %733 = vmatprep.subr.mxu1 %v195_v15 }
  0x68   : > { %693 = vmatpush3.msra.mxu0 %v195_v15  ;;  %749 = vmatpush3.msra.mxu1 %v195_v15 }
  0x69   : > { %694 = vmatprep.mubr.f32.mxu0 %v179_v16  ;;  %706 = vmatprep.mubr.f32.mxu1 %v187_v17 }
  0x6a   : > { %695 = vmatmul.mubr.f32.vlgmr.msra.gmra.mxu0 %v180_v18  ;;  %707 = vmatmul.mubr.f32.vlgmr.msra.gmra.mxu1 %v188_v19 }
  0x6b   : > { %697 = vmatprep.mubr.f32.mxu0 %v181_v20  ;;  %709 = vmatprep.mubr.f32.mxu1 %v189_v21 }
  0x6e   : > { %698 = vmatmul.mubr.f32.gmra.mxu0 %v182_v22  ;;  %710 = vmatmul.mubr.f32.gmra.mxu1 %v190_v23 }
  0x6f   : > { %700 = vmatprep.mubr.f32.mxu0 %v183_v24  ;;  %712 = vmatprep.mubr.f32.mxu1 %v191_v25 }
  0x72   : > { %701 = vmatmul.mubr.f32.gmra.mxu0 %v184_v26  ;;  %713 = vmatmul.mubr.f32.gmra.mxu1 %v192_v27 }
  0x73   : > { %703 = vmatprep.mubr.f32.mxu0 %v185_v28  ;;  %715 = vmatprep.mubr.f32.mxu1 %v193_v29 }
  0x76   : > { %704 = vmatmul.mubr.f32.gmra.mxu0 %v186_v30  ;;  %716 = vmatmul.mubr.f32.gmra.mxu1 %v194_v31 }
 0x12a   : > { %v696_v32 = vpop.f32.mrf.mxu0  ;;  %v708_v33 = vpop.f32.mrf.mxu1 }
 0x12c   : > { %v277_v34 = vpop.f32.mrf.mxu0  ;;  %v317_v35 = vpop.f32.mrf.mxu1 }
 0x12d   : > { %v586_v36 = vpack.c.bf16 %v696_v32, %v277_v34  ;;  %v606_v37 = vpack.c.bf16 %v708_v33, %v317_v35 }
 0x12e   : > { %v699_v38 = vpop.f32.mrf.mxu0  ;;  %v711_v39 = vpop.f32.mrf.mxu1 }
 0x12f   : > { %587 = vst [vmem:[%s176_s17] sm:$0xff] %v586_v36   ;;  %626 = vst [vmem:[%s176_s17 + $0x20] sm:$0xff] %v606_v37  }
 0x130   : > { %v287_v40 = vpop.f32.mrf.mxu0  ;;  %v327_v41 = vpop.f32.mrf.mxu1 }
 0x131   : > { %v591_v42 = vpack.c.bf16 %v699_v38, %v287_v40  ;;  %v611_v43 = vpack.c.bf16 %v711_v39, %v327_v41 }
 0x132   : > { %v702_v44 = vpop.f32.mrf.mxu0  ;;  %v714_v45 = vpop.f32.mrf.mxu1 }
 0x133   : > { %623 = vst [vmem:[%s176_s17 + $0x8] sm:$0xff] %v591_v42   ;;  %627 = vst [vmem:[%s176_s17 + $0x28] sm:$0xff] %v611_v43  }
 0x134   : > { %v297_v46 = vpop.f32.mrf.mxu0  ;;  %v337_v47 = vpop.f32.mrf.mxu1 }
 0x135   : > { %v596_v48 = vpack.c.bf16 %v702_v44, %v297_v46  ;;  %v616_v49 = vpack.c.bf16 %v714_v45, %v337_v47 }
 0x136   : > { %v705_v50 = vpop.f32.mrf.mxu0  ;;  %v717_v51 = vpop.f32.mrf.mxu1 }
 0x137   : > { %624 = vst [vmem:[%s176_s17 + $0x10] sm:$0xff] %v596_v48   ;;  %628 = vst [vmem:[%s176_s17 + $0x30] sm:$0xff] %v616_v49  }
 0x138   : > { %v307_v52 = vpop.f32.mrf.mxu0  ;;  %v347_v53 = vpop.f32.mrf.mxu1 }
 0x139   : > { %v601_v54 = vpack.c.bf16 %v705_v50, %v307_v52  ;;  %v621_v55 = vpack.c.bf16 %v717_v51, %v347_v53 }
 0x13b   : > { %625 = vst [vmem:[%s176_s17 + $0x18] sm:$0xff] %v601_v54   ;;  %629 = vst [vmem:[%s176_s17 + $0x38] sm:$0xff] %v621_v55  }
 0x13c   : > { %878 = shalt.err (!%p875_p0)
}
 0x13d   : > { %s879_s3 = scalar_lea.hbm %s1116_s19, 1024  ;;  %s883_s7 = scalar_lea.hbm %s1161_s2, 2048 }
 0x13e   : > { %p880_p5 = scmp.ne.s32.totalorder %s1116_s19, %s879_s3  ;;  %p884_p4 = scmp.lt.s32.totalorder %s1116_s19, %s1161_s2 }
 0x13f   : > { %p885_p6 = scmp.lt.s32.totalorder %s883_s7, %s879_s3 }
 0x140   : > { %p881_p2 = pnand %p880_p5, %p1177_p11 }
 0x141   : > { %p886_p8 = por %p885_p6, %p884_p4 }
 0x142   : > { %p882_p1 = pneg %p881_p2 }
 0x144   : > { %p887_p3 = pnand %p886_p8, %p882_p1 }
 0x146   : > { %890 = shalt.err (!%p887_p3)
}
 0x147   : > { %s940_s24 = smov 64   ;;  %s941_s15 = smov 4  }
 0x148   : > { %756 = dma.vmem_to_hbm [thread:$0]  (%p1177_p11), %s1111_s25, 1024, %s1116_s19, %s437_s13, %s940_s24, %s940_s24, %s941_s15  }
 0x149 PF: > { %s465_s17 = sand.u32 1, %s921_s9   ;;  %p1178_p7 = scmp.ne.s32.totalorder %s1167_s16, 0 }
 0x14a   : > { %p1179_p9 = scmp.ge.s32.totalorder %s933_s12, 2  ;;  %s466_s26 = scalar_lea.sflag [#allocation4], %s465_s17 }
 0x14c   : > { %p767_p10 = pnand %p1179_p9, %p1178_p7 }
 0x14e   : > { %p768_p12 = pneg %p767_p10 }
 0x150   : > { %916 = dma.done.wait (%p768_p12), %s466_s26, 1024  }
 0x151   : > { %918 = vsyncadd (%p768_p12), %s466_s26, 4294966272  ;;  %p16_p13 = scmp.ge.s32.totalorder %s1011_s21, 4   ;;  %s1180_s9 = smov %s925_s10 }
 0x152   : > { %s1181_s10 = smov %s929_s11  ;;  %s1182_s11 = smov %s1031_s29 }
 0x153   : > { %s1183_s12 = smov %s1011_s21  ;;  %18 = sbr.rel (!%p16_p13) target bundleno = 6 (0x6), region = 77 }
 0x158   :  { %471 = vsyncpa [#allocation3], 1 }
 0x159   :  { %473 = vsyncpa [#allocation3 + $0x1], 1 }
 0x15a   :  { %474 = vsyncpa [#allocation6], 1 }
 0x15b   :  { %475 = vsyncpa [#allocation4], 1 }
 0x15c   :  { %477 = vsyncpa [#allocation4 + $0x1], 1 }

</bundles_post_ra>
